<compile_context>
chip_gen: v7x
topology: tpu7x:2x2x1
jax: 0.10.0
libtpu: 0.0.40
codegen_flags: <defaults>
</compile_context>

<pallas_src>
import functools

import jax
import jax.numpy as jnp
from jax.experimental import pallas as pl
from jax.experimental.pallas import tpu as pltpu


def _smoothness_partial_kernel(masks_ref, w_ref, out_ref, *, W):
    """One grid step over TB batch elements, channels 0..1 flattened on lanes.

    masks_ref : (2, L) resident f32 validity masks
                row 0 -> H-direction (position j pairs with j - W in its plane)
                row 1 -> W-direction (position j pairs with j - 1 in its row)
    w_ref     : (TB, L) tile: channel-0 plane then channel-1 plane (row-major
                H, W inside each plane), zero-padded on lanes up to L.
    out_ref   : (1, 2) SMEM partial sums (H-direction, W-direction), both
                channels. 1/delta^2 scaling and the mean's divide-by-count
                happen in the wrapper.
    """
    x = w_ref[...]

    # d/dH: x[j] - x[j - W]. pltpu.roll handles both channel planes in a single
    # lane-aligned pass on the XLU slot (no sliced vld / lane relayouts).
    dh = (x - pltpu.roll(x, W, axis=1)).astype(jnp.float32)
    out_ref[0, 0] = jnp.sum(dh * dh * masks_ref[0:1, :])

    # d/dW: x[j] - x[j - 1]; row/plane/pad boundary lanes masked out.
    dw = (x - pltpu.roll(x, 1, axis=1)).astype(jnp.float32)
    out_ref[0, 1] = jnp.sum(dw * dw * masks_ref[1:2, :])


def _vmem_budget():
    """(target block bytes, scoped VMEM limit), tuned per chip generation."""
    phys = None
    try:
        info = pltpu.get_tpu_info()
        for name in ("vmem_capacity_bytes", "vmem_size_bytes", "vmem_bytes"):
            val = getattr(info, name, None)
            if isinstance(val, int) and val > 0:
                phys = val
                break
    except Exception:
        phys = None
    if not phys:
        phys = 64 * 1024 * 1024                      # conservative: v7x per-TC VMEM
    limit = min((phys * 3) // 4, 96 * 1024 * 1024)   # v7x: 48 MiB; v5e/v6e: 96 MiB
    target = max(4 * 1024 * 1024, limit // 4)        # 2x double-buffered blocks << limit
    return target, limit


def _pick_batch_tile(B, bytes_per_batch, target_bytes, min_sublane):
    """Choose (tb, padded_B) with tb sublane-legal (tb % min_sublane == 0 or tb == B)."""
    cap = max(1, int(target_bytes // bytes_per_batch))
    if B <= cap:
        # Whole batch fits in one block; split in two for megacore when legal.
        half = B // 2
        if B >= 2 * min_sublane and half % min_sublane == 0:
            return half, B
        return B, B
    tb_max = (cap // min_sublane) * min_sublane
    if tb_max == 0:
        # A single 2-channel plane exceeds the per-step budget.
        # TODO(synk): tile along H with a one-row halo for very large planes.
        tb = min(B, min_sublane)
        return tb, -(-B // tb) * tb
    # Pick the sublane-multiple tile that minimizes batch padding (ties -> larger tb).
    best = None
    for d in range(min_sublane, tb_max + 1, min_sublane):
        padded = -(-B // d) * d
        if best is None or padded < best[1] or (padded == best[1] and d > best[0]):
            best = (d, padded)
    return best


def smoothness_loss(w, delta=1.0):
    """Pallas TPU implementation of SmoothnessLoss with loss = MSE (mean)."""
    B, C, H, W = w.shape
    assert C >= 2, "SmoothnessLoss needs at least 2 channels (u, v)"
    assert H >= 2 and W >= 2, "need at least 2 pixels along each spatial dim"
    HW = H * W
    two_hw = 2 * HW
    itemsize = jnp.dtype(w.dtype).itemsize
    min_sublane = {4: 8, 2: 16, 1: 32}.get(itemsize, 8)

    # Select channels 0..1 through the BlockSpec (zero-copy) when the block's
    # lane width is 128-aligned; otherwise fall back to a single XLA slice.
    if C > 2 and two_hw % 128 == 0:
        w_flat = w.reshape(B, C * HW)          # free reshape of contiguous NCHW
    else:
        # TODO(synk): for C > 2 with unaligned 2*H*W, avoid this materialized
        # slice (pad W to a 128-friendly width or use allow_input_fusion).
        w2 = w if C == 2 else w[:, :2]
        w_flat = w2.reshape(B, two_hw)

    # Lane-pad the block width to a 128 multiple so the in-kernel roll / stores
    # stay on aligned, unmasked layouts. Padded lanes are masked out below.
    block_lane = -(-two_hw // 128) * 128
    if w_flat.shape[1] < block_lane:
        w_flat = jnp.pad(w_flat, ((0, 0), (0, block_lane - w_flat.shape[1])))

    # Validity masks, built once here and resident in VMEM for every grid step.
    col = jnp.arange(block_lane, dtype=jnp.int32)
    in_range = col < two_hw
    mask_h = (in_range & ((col % HW) >= W)).astype(jnp.float32)   # pairs with j - W
    mask_w = (in_range & ((col % W) != 0)).astype(jnp.float32)    # pairs with j - 1
    masks = jnp.stack([mask_h, mask_w], axis=0)                    # (2, block_lane)

    target_bytes, vmem_limit = _vmem_budget()
    bytes_per_batch = block_lane * itemsize
    tb, padded_B = _pick_batch_tile(B, bytes_per_batch, target_bytes, min_sublane)
    if padded_B > B:
        # Zero-padded batch rows contribute zero to the sums; counts below use B.
        w_flat = jnp.pad(w_flat, ((0, padded_B - B), (0, 0)))
    num_steps = padded_B // tb

    kernel = functools.partial(_smoothness_partial_kernel, W=W)

    cost = pl.CostEstimate(
        flops=int(padded_B * block_lane * 2 * 4),
        transcendentals=0,
        bytes_accessed=int(padded_B * block_lane * itemsize
                           + 2 * block_lane * 4 + num_steps * 2 * 4),
    )

    partial = pl.pallas_call(
        kernel,
        out_shape=jax.ShapeDtypeStruct((num_steps, 2), jnp.float32),
        grid_spec=pltpu.PrefetchScalarGridSpec(
            num_scalar_prefetch=0,
            grid=(num_steps,),
            in_specs=[
                # Resident masks (same block every step -> fetched once).
                pl.BlockSpec((2, block_lane), lambda i: (0, 0)),
                # One contiguous DMA per step: tb batches x channels 0..1.
                pl.BlockSpec((tb, block_lane), lambda i: (i, 0)),
            ],
            # Per-step partial sums (no resident accumulator) -> parallel grid.
            out_specs=pl.BlockSpec((1, 2), lambda i: (i, 0),
                                   memory_space=pltpu.SMEM),
        ),
        compiler_params=pltpu.CompilerParams(
            dimension_semantics=("parallel",),
            vmem_limit_bytes=vmem_limit,
        ),
        cost_estimate=cost,
    )(masks, w_flat)

    sum_h = jnp.sum(partial[:, 0])            # H-direction diffs, both channels
    sum_w = jnp.sum(partial[:, 1])            # W-direction diffs, both channels
    inv_d2 = 1.0 / (float(delta) * float(delta))
    return inv_d2 * (sum_h / (B * (H - 1) * W) + sum_w / (B * H * (W - 1)))


def smoothness_loss_ref(w, delta=1.0):
    """Pure-JAX reference (mirrors the PyTorch forward with loss = MSE)."""
    dudx = (w[:, 0, 1:, :] - w[:, 0, :-1, :]) / delta
    dudy = (w[:, 0, :, 1:] - w[:, 0, :, :-1]) / delta
    dvdx = (w[:, 1, 1:, :] - w[:, 1, :-1, :]) / delta
    dvdy = (w[:, 1, :, 1:] - w[:, 1, :, :-1]) / delta
    return (jnp.mean(dudx * dudx) + jnp.mean(dudy * dudy)
            + jnp.mean(dvdx * dvdx) + jnp.mean(dvdy * dvdy))


if __name__ == "__main__":
    key = jax.random.PRNGKey(0)
    k1, k2 = jax.random.split(key)

    # Case 1: NCHW with extra channels (C > 2); channel select via BlockSpec.
    B, C, H, W = 2, 4, 16, 16
    w1 = jax.random.normal(k1, (B, C, H, W), dtype=jnp.float32)
    out1 = jax.block_until_ready(smoothness_loss(w1, delta=1.0))
    ref1 = smoothness_loss_ref(w1, delta=1.0)
    assert jnp.allclose(out1, ref1, rtol=1e-5, atol=1e-5), (out1, ref1)

    # Case 2: plain 2-channel flow field, non-unit delta.
    w2 = jax.random.normal(k2, (4, 2, 8, 16), dtype=jnp.float32)
    out2 = jax.block_until_ready(smoothness_loss(w2, delta=2.0))
    ref2 = smoothness_loss_ref(w2, delta=2.0)
    assert jnp.allclose(out2, ref2, rtol=1e-5, atol=1e-5), (out2, ref2)

    print("KERNEL_OK")
</pallas_src>

<mosaic_0001>
module attributes {stable_mosaic.version = 11 : i64} {
  func.func @_smoothness_partial_kernel(%arg0: i32, %arg1: memref<2x512xf32, #tpu.memory_space<vmem>>, %arg2: memref<2x512xf32, #tpu.memory_space<vmem>>, %arg3: memref<1x2xf32, #tpu.memory_space<smem>>) attributes {dimension_semantics = [#tpu.dimension_semantics<parallel>], iteration_bounds = array<i64: 1>, scalar_prefetch = 0 : i64, scratch_operands = 0 : i64, tpu.core_type = #tpu.core_type<tc>, window_params = [{pipeline_mode = #tpu.pipeline_mode<synchronous>, transform_indices = @transform_0, window_bounds = array<i64: 2, 512>}, {transform_indices = @transform_1, window_bounds = array<i64: 2, 512>}, {transform_indices = @transform_2, window_bounds = array<i64: 1, 2>}]} {
    %c0 = arith.constant 0 : index
    %c0_0 = arith.constant 0 : index
    %0 = vector.load %arg2[%c0, %c0_0] : memref<2x512xf32, #tpu.memory_space<vmem>>, vector<2x512xf32>
    %c16_i32 = arith.constant 16 : i32
    %1 = tpu.dynamic_rotate %0 by %c16_i32 dim 1 : vector<2x512xf32>, i32 -> vector<2x512xf32>
    %2 = arith.subf %0, %1 : vector<2x512xf32>
    %3 = arith.mulf %2, %2 : vector<2x512xf32>
    %c0_1 = arith.constant 0 : index
    %c0_2 = arith.constant 0 : index
    %4 = vector.load %arg1[%c0_1, %c0_2] : memref<2x512xf32, #tpu.memory_space<vmem>>, vector<1x512xf32>
    %5 = vector.broadcast %4 : vector<1x512xf32> to vector<2x512xf32>
    %6 = arith.mulf %3, %5 : vector<2x512xf32>
    %7 = vector.shape_cast %6 : vector<2x512xf32> to vector<1x2x512xf32>
    %cst = arith.constant dense<0.000000e+00> : vector<1xf32>
    %8 = vector.multi_reduction <add>, %7, %cst [1, 2] : vector<1x2x512xf32> to vector<1xf32>
    %9 = vector.shape_cast %8 : vector<1xf32> to vector<1x1x1xf32>
    %10 = vector.extract %9[0, 0, 0] : f32 from vector<1x1x1xf32>
    %c0_3 = arith.constant 0 : index
    %c0_4 = arith.constant 0 : index
    %11 = memref.load %arg3[%c0_3, %c0_4] : memref<1x2xf32, #tpu.memory_space<smem>>
    memref.store %10, %arg3[%c0_3, %c0_4] : memref<1x2xf32, #tpu.memory_space<smem>>
    %c1_i32 = arith.constant 1 : i32
    %12 = tpu.dynamic_rotate %0 by %c1_i32 dim 1 : vector<2x512xf32>, i32 -> vector<2x512xf32>
    %13 = arith.subf %0, %12 : vector<2x512xf32>
    %14 = arith.mulf %13, %13 : vector<2x512xf32>
    %c1 = arith.constant 1 : index
    %c0_5 = arith.constant 0 : index
    %15 = vector.load %arg1[%c1, %c0_5] : memref<2x512xf32, #tpu.memory_space<vmem>>, vector<1x512xf32>
    %16 = vector.broadcast %15 : vector<1x512xf32> to vector<2x512xf32>
    %17 = arith.mulf %14, %16 : vector<2x512xf32>
    %18 = vector.shape_cast %17 : vector<2x512xf32> to vector<1x2x512xf32>
    %cst_6 = arith.constant dense<0.000000e+00> : vector<1xf32>
    %19 = vector.multi_reduction <add>, %18, %cst_6 [1, 2] : vector<1x2x512xf32> to vector<1xf32>
    %20 = vector.shape_cast %19 : vector<1xf32> to vector<1x1x1xf32>
    %21 = vector.extract %20[0, 0, 0] : f32 from vector<1x1x1xf32>
    %c0_7 = arith.constant 0 : index
    %c1_8 = arith.constant 1 : index
    %22 = memref.load %arg3[%c0_7, %c1_8] : memref<1x2xf32, #tpu.memory_space<smem>>
    memref.store %21, %arg3[%c0_7, %c1_8] : memref<1x2xf32, #tpu.memory_space<smem>>
    return
  }
  func.func @transform_0(%arg0: i32) -> (i32, i32) {
    %c0_i32 = arith.constant 0 : i32
    %c0_i32_0 = arith.constant 0 : i32
    %c0_i32_1 = arith.constant 0 : i32
    return %c0_i32, %c0_i32_0 : i32, i32
  }
  func.func @transform_1(%arg0: i32) -> (i32, i32) {
    %c0_i32 = arith.constant 0 : i32
    %c0_i32_0 = arith.constant 0 : i32
    return %arg0, %c0_i32 : i32, i32
  }
  func.func @transform_2(%arg0: i32) -> (i32, i32) {
    %c0_i32 = arith.constant 0 : i32
    %c0_i32_0 = arith.constant 0 : i32
    return %arg0, %c0_i32 : i32, i32
  }
}

</mosaic_0001>

<bundles_post_ra>
// kernel: tpu_custom_call.1
= control target key start
LH: loop header
LB: loop body
LE: loop exit
PB: predicated region body
PF: predicated region fallthrough
CT: control target
= control target key end

     0   :  { %7 = vsyncpa [#allocation3], 0  ;;  %s475_s0 = inlined_call_operand.hbm [shape: f32[2,512], index: 0, kind: input, shape index: {}]   ;;  %s476_s1 = inlined_call_operand.hbm [shape: f32[2,1024], index: 1, kind: input, shape index: {}]   ;;  %s477_s2 = inlined_call_operand.hbm [shape: f32[1,2], index: 2, kind: output, shape index: {}]  }
   0x1   :  { %8 = vsyncpa [#allocation6], 0 }
   0x2   :  { %9 = vsyncpa [#allocation4], 0  ;;  %s377_s9 = smov [#allocation2]   ;;  %s378_s11 = smov [#allocation5]  }
   0x3   :  { %s16_s10 = sshll.u32 %s377_s9, 4  ;;  %s26_s12 = sshll.u32 %s378_s11, 4  ;;  %s17_s10 = int_to_ptr.vmem [resolvable:$true] %s16_s10  ;;  %s398_s12 = int_to_ptr.vmem [resolvable:$true] %s26_s12 }
   0x4   :  { %s317_s15 = scalar_lea.hbm %s475_s0, 128 }
   0x5   :  { %p318_p0 = scmp.ne.s32.totalorder %s475_s0, %s317_s15  ;;  %p321_p1 = scmp.lt.u32.totalorder %s317_s15, %s475_s0 }
   0x7   :  { %p323_p2 = pnand %p321_p1, %p318_p0 }
   0x9   :  { %326 = shalt.err (!%p323_p2)
}
   0xa   :  { %s327_s20 = scalar_lea.vmem %s17_s10, 128  ;;  %p332_p4 = scmp.lt.s32.totalorder %s17_s10, %s17_s10 }
   0xb   :  { %p328_p3 = scmp.ne.s32.totalorder %s17_s10, %s327_s20  ;;  %p333_p5 = scmp.lt.s32.totalorder %s327_s20, %s327_s20 }
   0xd   :  { %p334_p6 = por %p333_p5, %p332_p4 }
   0xf   :  { %p335_p7 = pnand %p334_p6, %p328_p3 }
  0x11   :  { %338 = shalt.err (!%p335_p7)
}
  0x12   :  { %19 = dma.hbm_to_vmem [thread:$0]  %s475_s0, 128, %s17_s10, [#allocation3]  }
  0x13   :  { %s339_s25 = scalar_lea.hbm %s476_s1, 128  ;;  %s341_s30 = scalar_lea.hbm %s476_s1, 256 }
  0x14   :  { %p340_p8 = scmp.ne.s32.totalorder %s476_s1, %s339_s25  ;;  %p342_p9 = scmp.lt.u32.totalorder %s341_s30, %s339_s25 }
  0x15   :  { %p343_p10 = scmp.lt.u32.totalorder %s339_s25, %s476_s1 }
  0x17   :  { %p344_p11 = por %p343_p10, %p342_p9 }
  0x19   :  { %p345_p12 = pnand %p344_p11, %p340_p8 }
  0x1b   :  { %348 = shalt.err (!%p345_p12)
}
  0x1c   :  { %s349_s0 = scalar_lea.vmem %s398_s12, 128  ;;  %p354_p0 = scmp.lt.s32.totalorder %s398_s12, %s398_s12 }
  0x1d   :  { %p350_p13 = scmp.ne.s32.totalorder %s398_s12, %s349_s0  ;;  %p355_p1 = scmp.lt.s32.totalorder %s349_s0, %s349_s0 }
  0x1f   :  { %p356_p2 = por %p355_p1, %p354_p0 }
  0x21   :  { %p357_p3 = pnand %p356_p2, %p350_p13 }
  0x23   :  { %360 = shalt.err (!%p357_p3)
}
  0x24   :  { %29 = dma.hbm_to_vmem [thread:$0]  %s476_s1, 128, %s398_s12, [#allocation6]  }
  0x25   :  { %371 = dma.done.wait [#allocation3], 128  }
  0x26   :  { %372 = vsyncadd [#allocation3], 4294967168 }
  0x27   :  { %373 = dma.done.wait [#allocation6], 128  }
  0x28   :  { %374 = vsyncadd [#allocation6], 4294967168  ;;  %v42_v0 = vlaneseq  ;;  %v379_v1 = vmov 1983009808   ;;  %v434_v6 = vld [vmem:[#allocation5] sm:$0xff]  ;;  %s380_s1 = smov 16  }
  0x29   :  { %v40_v2 = vunpack.c.l.s4 %v379_v1  ;;  %v38_v8 = vcombine.high %v434_v6, %v434_v6  ;;  %s381_s7 = smov 1   ;;  %v98_v18 = vld [vmem:[#allocation2] ss:$2 sm:$0xf]  ;;  %vm157_vm2 = vcmask 1041408   ;;  %s361_s12 = scalar_lea.hbm %s477_s2, 16 }
  0x2a   :  { %v43_v3 = vshrl.u32 %v42_v0, 7  ;;  %v68_v24 = vand.u32 127, %v42_v0  ;;  %v214_v26 = vld [vmem:[#allocation2 + $0x1] ss:$2 sm:$0xf]  ;;  %p362_p4 = scmp.ne.s32.totalorder %s477_s2, %s361_s12  ;;  %p365_p5 = scmp.lt.u32.totalorder %s361_s12, %s477_s2 }
  0x2b   :  { %v41_v4 = vunpack.c.0.s8 %v40_v2 }
  0x2c   :  { %v102_v13 = vsub.s32 0, %v43_v3  ;;  %v106_v14 = vsub.s32 1, %v43_v3  ;;  %v110_v15 = vsub.s32 2, %v43_v3  ;;  %v114_v16 = vsub.s32 3, %v43_v3  ;;  %p367_p6 = pnand %p365_p5, %p362_p4 }
  0x2d   :  { %v432_v5 = vsub.s32 %v41_v4, %v43_v3  ;;  %vm69_vm0 = vcmp.lt.s32.totalorder %v68_v24, 16  ;;  %vm184_vm1 = vcmp.lt.s32.totalorder %v68_v24, 1 }
  0x2e   :  { %v103_v20 = vrot.slane %v98_v18, %v102_v13  ;;  %v107_v21 = vrot.slane %v98_v18, %v106_v14  ;;  %v111_v22 = vrot.slane %v98_v18, %v110_v15  ;;  %v115_v23 = vrot.slane %v98_v18, %v114_v16 }
  0x2f   :  { %v45_v7 = vrot.slane %v434_v6, %v432_v5  ;;  %v52_v9 = vrot.slane %v38_v8, %v432_v5  ;;  %v219_v30 = vrot.slane %v214_v26, %v102_v13  ;;  %v223_v31 = vrot.slane %v214_v26, %v106_v14 }
  0x30   :  { %v116_v28 = vcombine.low %v103_v20, %v107_v21  ;;  %v117_v29 = vcombine.low %v111_v22, %v115_v23  ;;  %v227_v33 = vrot.slane %v214_v26, %v110_v15  ;;  %v231_v34 = vrot.slane %v214_v26, %v114_v16 }
  0x31   :  { %59 = vrot.lane.b32.xlu0 %v45_v7, %s380_s1  ;;  %63 = vrot.lane.b32.xlu1 %v52_v9, %s380_s1  ;;  %v53_v10 = vcombine.high %v45_v7, %v45_v7  ;;  %v54_v11 = vcombine.high %v52_v9, %v52_v9  ;;  %v232_v44 = vcombine.low %v219_v30, %v223_v31 }
  0x32   :  { %v124_v42 = vrot.slane %v116_v28, %v432_v5  ;;  %v131_v43 = vrot.slane %v117_v29, %v432_v5  ;;  %v233_v48 = vcombine.low %v227_v33, %v231_v34 }
  0x33   :  { %v240_v57 = vrot.slane %v232_v44, %v432_v5 }
  0x34   :  { %v132_v56 = vcombine.low %v124_v42, %v131_v43  ;;  %v247_v61 = vrot.slane %v233_v48, %v432_v5 }
  0x35   :  { %176 = vrot.lane.b32.xlu0 %v45_v7, %s381_s7  ;;  %178 = vrot.lane.b32.xlu1 %v53_v10, %s381_s7 }
  0x36   :  { %v248_v2 = vcombine.low %v240_v57, %v247_v61 }
  0x39   :  { %61 = vrot.lane.b32.xlu0 %v53_v10, %s380_s1  ;;  %65 = vrot.lane.b32.xlu1 %v54_v11, %s380_s1 }
  0x3d   :  { %180 = vrot.lane.b32.xlu0 %v52_v9, %s381_s7  ;;  %182 = vrot.lane.b32.xlu1 %v54_v11, %s381_s7 }
  0xa3   :  { %v60_v12 = vpop.permute.xlu0 %59  ;;  %v64_v17 = vpop.permute.xlu1 %63 }
  0xa7   :  { %v177_v19 = vpop.permute.xlu0 %176  ;;  %v179_v25 = vpop.permute.xlu1 %178 }
  0xa8   :  { %v187_v49 = vsel %vm184_vm1, %v177_v19, %v179_v25 }
  0xab   :  { %v62_v27 = vpop.permute.xlu0 %61  ;;  %v66_v32 = vpop.permute.xlu1 %65 }
  0xac   :  { %v71_v35 = vsel %vm69_vm0, %v62_v27, %v64_v17  ;;  %v72_v36 = vsel %vm69_vm0, %v60_v12, %v62_v27  ;;  %v70_v37 = vsel %vm69_vm0, %v64_v17, %v66_v32  ;;  %v73_v38 = vsel %vm69_vm0, %v66_v32, %v60_v12 }
  0xad   :  { %v78_v39 = vcombine.low %v73_v38, %v72_v36  ;;  %v79_v40 = vcombine.low %v71_v35, %v70_v37 }
  0xaf   :  { %v181_v41 = vpop.permute.xlu0 %180  ;;  %v86_v45 = vrot.slane %v78_v39, %v432_v5  ;;  %v93_v46 = vrot.slane %v79_v40, %v432_v5  ;;  %v183_v47 = vpop.permute.xlu1 %182 }
  0xb0   :  { %v186_v50 = vsel %vm184_vm1, %v179_v25, %v181_v41  ;;  %v185_v51 = vsel %vm184_vm1, %v181_v41, %v183_v47  ;;  %v188_v52 = vsel %vm184_vm1, %v183_v47, %v177_v19 }
  0xb1   :  { %v94_v53 = vcombine.low %v86_v45, %v93_v46  ;;  %v193_v54 = vcombine.low %v188_v52, %v187_v49  ;;  %v194_v55 = vcombine.low %v186_v50, %v185_v51 }
  0xb3   :  { %v96_v58 = vsub.f32 %v434_v6, %v94_v53  ;;  %v201_v59 = vrot.slane %v193_v54, %v432_v5  ;;  %v208_v60 = vrot.slane %v194_v55, %v432_v5 }
  0xb5   :  { %v97_v62 = vmul.f32 %v96_v58, %v96_v58  ;;  %v209_v63 = vcombine.low %v201_v59, %v208_v60 }
  0xb7   :  { %v211_v0 = vsub.f32 %v434_v6, %v209_v63  ;;  %v134_v1 = vmul.f32 %v132_v56, %v97_v62 }
  0xb9   :  { %v212_v3 = vmul.f32 %v211_v0, %v211_v0  ;;  %v136_v4 = vcombine.high %v134_v1, %v134_v1  ;;  %v143_v7 = vrot.slane %v134_v1, %v432_v5 }
  0xbb   :  { %v150_v8 = vrot.slane %v136_v4, %v432_v5  ;;  %v151_v9 = vcombine.high %v143_v7, %v143_v7  ;;  %v250_v10 = vmul.f32 %v248_v2, %v212_v3  ;;  %v158_v12 = vsel %vm157_vm2, %v143_v7, 0.0 }
  0xbd   :  { %v152_v11 = vcombine.high %v150_v8, %v150_v8  ;;  %v159_v13 = vsel %vm157_vm2, %v151_v9, 0.0  ;;  %v252_v14 = vcombine.high %v250_v10, %v250_v10  ;;  %v259_v6 = vrot.slane %v250_v10, %v432_v5 }
  0xbe   :  { %v160_v15 = vadd.f32 %v159_v13, %v158_v12  ;;  %v161_v16 = vsel %vm157_vm2, %v150_v8, 0.0 }
  0xbf   :  { %v266_v17 = vrot.slane %v252_v14, %v432_v5  ;;  %v267_v19 = vcombine.high %v259_v6, %v259_v6  ;;  %v163_v20 = vsel %vm157_vm2, %v152_v11, 0.0  ;;  %v273_v23 = vsel %vm157_vm2, %v259_v6, 0.0 }
  0xc0   :  { %v162_v18 = vadd.f32 %v161_v16, %v160_v15 }
  0xc1   :  { %v268_v22 = vcombine.high %v266_v17, %v266_v17  ;;  %v274_v24 = vsel %vm157_vm2, %v267_v19, 0.0  ;;  %v276_v26 = vsel %vm157_vm2, %v266_v17, 0.0 }
  0xc2   :  { %v164_v21 = vadd.f32 %v163_v20, %v162_v18  ;;  %v275_v25 = vadd.f32 %v274_v24, %v273_v23 }
  0xc3   :  { %v278_v28 = vsel %vm157_vm2, %v268_v22, 0.0 }
  0xc4   :  { %165 = vadd.xlane.f32.xlu0 %v164_v21  ;;  %v277_v27 = vadd.f32 %v276_v26, %v275_v25 }
  0xc6   :  { %v279_v29 = vadd.f32 %v278_v28, %v277_v27 }
  0xc8   :  { %280 = vadd.xlane.f32.xlu1 %v279_v29 }
 0x151   :  { %v166_v5 = vpop.xlane.xlu0 %165 }
 0x152   :  { %v167_v30 = vrot.slane %v166_v5, 4 }
 0x154   :  { %v168_v31 = vadd.f32 %v167_v30, %v166_v5 }
 0x155   :  { %v281_v33 = vpop.xlane.xlu1 %280 }
 0x156   :  { %v169_v32 = vrot.slane %v168_v31, 2  ;;  %v282_v34 = vrot.slane %v281_v33, 4 }
 0x158   :  { %v170_v35 = vadd.f32 %v169_v32, %v168_v31  ;;  %v283_v36 = vadd.f32 %v282_v34, %v281_v33 }
 0x15a   :  { %v171_v37 = vrot.slane %v170_v35, 1  ;;  %v284_v38 = vrot.slane %v283_v36, 2 }
 0x15c   :  { %v172_v39 = vadd.f32 %v171_v37, %v170_v35  ;;  %v285_v40 = vadd.f32 %v284_v38, %v283_v36 }
 0x15e   :  { %306 = vpush %v172_v39  ;;  %v286_v41 = vrot.slane %v285_v40, 1 }
 0x160   :  { %v287_v42 = vadd.f32 %v286_v41, %v285_v40 }
 0x162   :  { %308 = vpush %v287_v42 }
 0x18f   :  { %s307_s8 = spop %306 }
 0x190   :  { %175 = sst [smem:[#allocation7]] %s307_s8 }
 0x193   :  { %s309_s9 = spop %308 }
 0x194   :  { %290 = sst [smem:[#allocation7 + $0x1]] %s309_s9 }
 0x195   :  { %370 = shalt.err (!%p367_p6)
}
 0x196   :  { %s382_s17 = smov [#allocation7]  }
 0x197   :  { %298 = dma.smem_to_hbm %s382_s17, 16, %s477_s2, [#allocation4]  }
 0x198   :  { %375 = dma.done.wait [#allocation4], 16  }
 0x199   :  { %376 = vsyncadd [#allocation4], 4294967280 }
 0x19a   :  { %302 = sfence }
 0x19b   :  { %303 = vsyncpa [#allocation3], 1 }
 0x19c   :  { %304 = vsyncpa [#allocation6], 1 }
 0x19d   :  { %305 = vsyncpa [#allocation4], 1 }

</bundles_post_ra>
